<compile_context>
chip_gen: v7x
topology: tpu7x:2x2x1
jax: 0.10.0
libtpu: 0.0.40
codegen_flags: <defaults>
</compile_context>

<pallas_src>
import jax
import jax.numpy as jnp
from jax.experimental import pallas as pl
from jax.experimental.pallas import tpu as pltpu


def linear_kernel(w_ref, b_ref, x_ref, o_ref):
    # w_ref, b_ref: (1,) f32 scalars in SMEM; x_ref / o_ref: (tile_rows, lane)
    # f32 tiles in VMEM.  Pure VPU multiply-add: y = x * w + b.
    o_ref[...] = x_ref[...] * w_ref[0] + b_ref[0]


_SUBLANE = 8            # f32 sublane multiple (second-minor dim alignment)
_MAX_TILE_ROWS = 1024   # 1024 x 1024 x 4 B = 4 MiB max f32 tile


def _round_up(x, m):
    return pl.cdiv(x, m) * m


def _plan(n):
    """Pick (lane, rows_total, tile_rows, num_tiles) for the lane-dense slab."""
    if n >= 2 * _MAX_TILE_ROWS * 1024:
        lane = 1024   # large N: 4 MiB tiles, >= 2 tiles guaranteed (v7x 2-TC parallel)
    elif n >= 8 * 512:
        lane = 512    # mid N: single (or few) lane-dense tile(s), no many-step grid
    else:
        lane = 128    # tiny N: one minimal tile, padding stays negligible
    rows_total = _round_up(pl.cdiv(n, lane), _SUBLANE)   # pad only to 8*lane elems
    tile_rows = min(rows_total, _MAX_TILE_ROWS)
    num_tiles = pl.cdiv(rows_total, tile_rows)           # trailing tile may be partial
    return lane, rows_total, tile_rows, num_tiles


@jax.jit
def linear_forward(x, weight, bias):
    """y = x @ weight.T + bias with x (N, 1), weight (1, 1), bias (1,)."""
    n, k = x.shape
    assert k == 1 and weight.shape == (1, 1) and bias.shape == (1,)

    x = x.astype(jnp.float32)
    w_s = weight.reshape(1).astype(jnp.float32)   # (1,) SMEM scalar
    b_s = bias.reshape(1).astype(jnp.float32)     # (1,) SMEM scalar

    # ---- Lane-dense repack: (N, 1) -> (rows_total, lane) slab.  Pad only to one
    # sublane row-group (<= 8*lane - 1 extra elems); skip the pad if aligned.
    lane, rows_total, tile_rows, num_tiles = _plan(n)
    padded_n = rows_total * lane
    x_flat = x.reshape(n)
    if padded_n != n:
        x_flat = jnp.pad(x_flat, (0, padded_n - n))
    x_slab = x_flat.reshape(rows_total, lane)

    grid_spec = pl.GridSpec(
        grid=(num_tiles,),
        in_specs=[
            pl.BlockSpec(memory_space=pltpu.MemorySpace.SMEM),  # weight scalar
            pl.BlockSpec(memory_space=pltpu.MemorySpace.SMEM),  # bias scalar
            pl.BlockSpec((tile_rows, lane), lambda i: (i, 0)),  # x row-tile
        ],
        out_specs=pl.BlockSpec((tile_rows, lane), lambda i: (i, 0)),
    )

    y_slab = pl.pallas_call(
        linear_kernel,
        out_shape=jax.ShapeDtypeStruct((rows_total, lane), jnp.float32),
        grid_spec=grid_spec,
        compiler_params=pltpu.CompilerParams(
            # Shards row-tiles across the 2 TCs on v7x; neutral on v5e/v6e.
            dimension_semantics=("parallel",),
            # Worst case: 2 arrays x 2 buffers x 4 MiB tile = 16 MiB << 32 MiB;
            # portable to v7x's 64 MiB physical VMEM.
            vmem_limit_bytes=32 * 1024 * 1024,
            # Let XLA fuse the pad/reshape producer of x_slab into the Pallas
            # input DMA instead of materializing an extra HBM pass.
            allow_input_fusion=[False, False, True],
        ),
    )(w_s, b_s, x_slab)

    # Un-pad (only when padding was actually added) and restore nn.Linear's
    # (N, 1) output layout.
    if padded_n != n:
        return y_slab.reshape(padded_n)[:n].reshape(n, 1)
    return y_slab.reshape(n, 1)


if __name__ == "__main__":
    key = jax.random.PRNGKey(0)
    kx, kw, kb, kx2 = jax.random.split(key, 4)

    # Parameter init mimicking torch.nn.Linear(1, 1):
    # uniform(-1/sqrt(in_features), 1/sqrt(in_features)) = uniform(-1, 1)
    weight = jax.random.uniform(kw, (1, 1), jnp.float32, minval=-1.0, maxval=1.0)
    bias = jax.random.uniform(kb, (1,), jnp.float32, minval=-1.0, maxval=1.0)

    # Small batch of scalar features, consistent with Linear(1, 1).
    x = jax.random.normal(kx, (8, 1), jnp.float32)
    y = jax.block_until_ready(linear_forward(x, weight, bias))
    y_ref = x @ weight.T + bias
    assert y.shape == (8, 1)
    assert jnp.allclose(y, y_ref, atol=1e-6), "mismatch vs reference (small)"

    # Second check exercising the mid-size single-tile + padding path.
    x2 = jax.random.normal(kx2, (5000, 1), jnp.float32)
    y2 = jax.block_until_ready(linear_forward(x2, weight, bias))
    y2_ref = x2 @ weight.T + bias
    assert y2.shape == (5000, 1)
    assert jnp.allclose(y2, y2_ref, atol=1e-6), "mismatch vs reference (mid)"

    print("KERNEL_OK")
</pallas_src>

<mosaic_0001>
module attributes {stable_mosaic.version = 11 : i64} {
  func.func @linear_kernel(%arg0: i32, %arg1: memref<1xf32, #tpu.memory_space<smem>>, %arg2: memref<1xf32, #tpu.memory_space<smem>>, %arg3: memref<8x128xf32, #tpu.memory_space<vmem>>, %arg4: memref<8x128xf32, #tpu.memory_space<vmem>>) attributes {dimension_semantics = [#tpu.dimension_semantics<parallel>], iteration_bounds = array<i64: 1>, scalar_prefetch = 0 : i64, scratch_operands = 0 : i64, tpu.core_type = #tpu.core_type<tc>, window_params = [{transform_indices = @transform_0, window_bounds = array<i64: 1>}, {transform_indices = @transform_1, window_bounds = array<i64: 1>}, {transform_indices = @transform_2, window_bounds = array<i64: 8, 128>}, {transform_indices = @transform_3, window_bounds = array<i64: 8, 128>}]} {
    %c0 = arith.constant 0 : index
    %c0_0 = arith.constant 0 : index
    %0 = vector.load %arg3[%c0, %c0_0] : memref<8x128xf32, #tpu.memory_space<vmem>>, vector<8x128xf32>
    %c0_1 = arith.constant 0 : index
    %1 = memref.load %arg1[%c0_1] : memref<1xf32, #tpu.memory_space<smem>>
    %2 = vector.broadcast %1 : f32 to vector<8x128xf32>
    %3 = arith.mulf %0, %2 : vector<8x128xf32>
    %c0_2 = arith.constant 0 : index
    %4 = memref.load %arg2[%c0_2] : memref<1xf32, #tpu.memory_space<smem>>
    %5 = vector.broadcast %4 : f32 to vector<8x128xf32>
    %6 = arith.addf %3, %5 : vector<8x128xf32>
    %c0_3 = arith.constant 0 : index
    %c0_4 = arith.constant 0 : index
    %7 = vector.load %arg4[%c0_3, %c0_4] : memref<8x128xf32, #tpu.memory_space<vmem>>, vector<8x128xf32>
    tpu.vector_store %arg4[%c0_3, %c0_4], %6 {strides = array<i32>} : memref<8x128xf32, #tpu.memory_space<vmem>>, vector<8x128xf32>,
    return
  }
  func.func @transform_0(%arg0: i32) -> i32 {
    %c0_i32 = arith.constant 0 : i32
    %c0_i32_0 = arith.constant 0 : i32
    return %c0_i32 : i32
  }
  func.func @transform_1(%arg0: i32) -> i32 {
    %c0_i32 = arith.constant 0 : i32
    %c0_i32_0 = arith.constant 0 : i32
    return %c0_i32 : i32
  }
  func.func @transform_2(%arg0: i32) -> (i32, i32) {
    %c0_i32 = arith.constant 0 : i32
    %c0_i32_0 = arith.constant 0 : i32
    return %arg0, %c0_i32 : i32, i32
  }
  func.func @transform_3(%arg0: i32) -> (i32, i32) {
    %c0_i32 = arith.constant 0 : i32
    %c0_i32_0 = arith.constant 0 : i32
    return %arg0, %c0_i32 : i32, i32
  }
}

</mosaic_0001>

<bundles_post_ra>
// kernel: linear_forward.2
= control target key start
LH: loop header
LB: loop body
LE: loop exit
PB: predicated region body
PF: predicated region fallthrough
CT: control target
= control target key end

     0   :  { %v19_v2 = vlaneseq  ;;  %s77_s0 = inlined_call_operand.<no memory space> [shape: f32[1], index: 0, kind: input, shape index: {}]   ;;  %s78_s1 = inlined_call_operand.<no memory space> [shape: f32[1], index: 1, kind: input, shape index: {}]   ;;  %s79_s2 = inlined_call_operand.vmem [shape: f32[8], index: 2, kind: input, shape index: {}]   ;;  %s80_s3 = inlined_call_operand.<no memory space> [shape: f32[], index: 3, kind: input, shape index: {}]   ;;  %s81_s4 = inlined_call_operand.vmem [shape: f32[8,128], index: 4, kind: output, shape index: {}]  }
   0x1   :  { %v11_v0 = vstv %s80_s3  ;;  %v18_v1 = vld [vmem:[%s79_s2] sm:$0x1]  ;;  %v27_v3 = vstv %s77_s0  ;;  %v30_v5 = vstv %s78_s1 }
   0x2   :  { %vm21_vm0 = vcmp.lt.s32.totalorder %v19_v2, 8 }
   0x3   :  { %v22_v4 = vsel %vm21_vm0, %v18_v1, %v11_v0 }
   0x4   :  { %v28_v6 = vmul.f32 %v27_v3, %v22_v4 }
   0x6   :  { %v31_v7 = vadd.f32 %v30_v5, %v28_v6 }
   0x8   :  { %32 = vst [vmem:[%s81_s4] sm:$0xff] %v31_v7 }

</bundles_post_ra>
